<compile_context>
chip_gen: v5e
topology: v5e:2x2
jax: 0.10.0
libtpu: 0.0.40
codegen_flags: <defaults>
</compile_context>

<pallas_src>
import math
import functools

import jax
import jax.numpy as jnp
from jax import lax
from jax.experimental import pallas as pl
from jax.experimental.pallas import tpu as pltpu


_NEG_BIG = -1e30                      # finite "-inf" for the causal mask
_LN_EPS = 1e-5


def _layernorm(x, gamma, beta, eps=_LN_EPS):
    # x: (T, C) f32, gamma/beta: (1, C) f32
    mean = jnp.mean(x, axis=-1, keepdims=True)
    var = jnp.mean(jnp.square(x - mean), axis=-1, keepdims=True)
    inv = lax.rsqrt(var + eps)
    return (x - mean) * inv * gamma + beta


# ---------------------------------------------------------------------------
# Hardware-awareness helpers
# ---------------------------------------------------------------------------
@functools.lru_cache(maxsize=1)
def _vmem_budget():
    """(vmem_limit_bytes, vmem_capacity_bytes), generation aware."""
    try:
        cap = int(pltpu.get_tpu_info().vmem_capacity_bytes)
        if cap <= 0:
            raise ValueError("bad vmem capacity")
    except Exception:
        cap = 64 * 1024 * 1024                     # conservative fallback
        return cap, cap
    if cap >= 128 * 1024 * 1024:                   # v5e / v6e (128 MiB)
        return 100 * 1024 * 1024, cap
    # v7x-class (64 MiB): leave headroom for compiler scratch / spill
    return max(cap - 12 * 1024 * 1024, 32 * 1024 * 1024), cap


@functools.lru_cache(maxsize=1)
def _buffered1_supported():
    """Probe whether pipeline_mode=pl.Buffered(1) works on this jax/libtpu."""
    if not hasattr(pl, "Buffered"):
        return False
    try:
        def _k(w_ref, x_ref, o_ref):
            o_ref[...] = x_ref[...] + w_ref[...]

        f = pl.pallas_call(
            _k,
            out_shape=jax.ShapeDtypeStruct((16, 128), jnp.float32),
            grid=(2,),
            in_specs=[
                pl.BlockSpec((8, 128), lambda i: (0, 0),
                             pipeline_mode=pl.Buffered(1)),   # constant block
                pl.BlockSpec((8, 128), lambda i: (i, 0)),
            ],
            out_specs=pl.BlockSpec((8, 128), lambda i: (i, 0)),
        )
        jax.block_until_ready(
            f(jnp.zeros((8, 128), jnp.float32),
              jnp.ones((16, 128), jnp.float32)))
        return True
    except Exception:
        return False


def _const_spec(shape, single_buffer):
    """Spec for a block whose index never changes (weights / biases / LN)."""
    index_map = lambda *_: (0,) * len(shape)       # works for any grid arity
    if single_buffer:
        return pl.BlockSpec(shape, index_map, pipeline_mode=pl.Buffered(1))
    return pl.BlockSpec(shape, index_map)


def _pick_tile(T, preferred):
    t = min(preferred, T)
    if t >= 1 and T % t == 0:
        return t
    t = (t // 8) * 8
    while t >= 8 and T % t != 0:
        t -= 8
    return t if (t >= 8 and T % t == 0) else T


def _fused_attn_mlp_fits(C, tq, tk, n_head, out_itemsize, vmem_limit, buf1):
    """Rough VMEM residency estimate of kernel 2 with the MLP fused in."""
    wbuf = 1 if buf1 else 2
    const_bytes = wbuf * (2 * (C * C + C * 4 * C + 4 * C * C)   # bf16 weights
                          + 4 * (C + C + C + 4 * C + C))        # f32 bias / LN
    stream_bytes = 2 * (4 * tq * C                # x tile (f32)
                        + 2 * tq * C              # q tile (bf16)
                        + 2 * 2 * tk * C          # k + v tiles (bf16)
                        + out_itemsize * tq * C)  # output tile
    scratch_bytes = 4 * tq * C + 2 * 4 * tq * 128  # acc + m/l (lane-padded)
    live_bytes = 4 * tq * 4 * C + 6 * 4 * tq * tk  # f32 MLP act + score temps
    total = const_bytes + stream_bytes + scratch_bytes + live_bytes
    return total * 1.3 < vmem_limit


# ---------------------------------------------------------------------------
# Kernel 1: LayerNorm(x) -> fused qkv projection (one (C, 3C) matmul).
# 1/sqrt(hd) is pre-folded into the q columns of the weight/bias.
# ---------------------------------------------------------------------------
def _ln_qkv_kernel(x_ref, g1_ref, b1_ref, w_ref, b_ref, q_ref, k_ref, v_ref):
    C = q_ref.shape[-1]
    x = x_ref[0].astype(jnp.float32)                              # (TQ, C)
    h = _layernorm(x, g1_ref[...], b1_ref[...]).astype(jnp.bfloat16)
    qkv = (jnp.dot(h, w_ref[...], preferred_element_type=jnp.float32)
           + b_ref[...])                                          # (TQ, 3C) f32
    q_ref[0] = qkv[:, :C].astype(q_ref.dtype)
    k_ref[0] = qkv[:, C:2 * C].astype(k_ref.dtype)
    v_ref[0] = qkv[:, 2 * C:].astype(v_ref.dtype)


# ---------------------------------------------------------------------------
# Kernel 2: flash attention over a compact causal (qi, ki) schedule
#           + output projection + residual, optionally fused LN2 + MLP.
# ---------------------------------------------------------------------------
def _attn_kernel(qi_ref, ki_ref, x_ref, q_ref, k_ref, v_ref,
                 wap_ref, bap_ref, *rest,
                 n_head, tq, tk, num_kv, fuse_mlp):
    if fuse_mlp:
        (g2_ref, b2_ref, wfc_ref, bfc_ref, wmp_ref, bmp_ref,
         o_ref, acc_sc, m_sc, l_sc) = rest
    else:
        o_ref, acc_sc, m_sc, l_sc = rest

    p = pl.program_id(1)
    qi = qi_ref[p]
    ki = ki_ref[p]
    ki_last = jnp.minimum(num_kv - 1, (qi * tq + tq - 1) // tk)

    C = acc_sc.shape[-1]
    hd = C // n_head

    @pl.when(ki == 0)                 # first kv tile of each q-tile group
    def _init():
        acc_sc[...] = jnp.zeros(acc_sc.shape, acc_sc.dtype)
        m_sc[...] = jnp.full(m_sc.shape, _NEG_BIG, m_sc.dtype)
        l_sc[...] = jnp.zeros(l_sc.shape, l_sc.dtype)

    def tile_update(masked):
        # q is pre-scaled by 1/sqrt(hd) (folded into the projection weights).
        q = q_ref[0]                  # (TQ, C) bf16
        k = k_ref[0]                  # (TK, C) bf16
        v = v_ref[0]                  # (TK, C) bf16
        if masked:
            row = qi * tq + lax.broadcasted_iota(jnp.int32, (tq, tk), 0)
            col = ki * tk + lax.broadcasted_iota(jnp.int32, (tq, tk), 1)
            causal = col <= row       # only built for diagonal tiles
        m_prev = m_sc[...]            # (TQ, H) f32
        l_prev = l_sc[...]
        m_cols, l_cols, alpha_cols, pv_cols = [], [], [], []
        # Static head loop; the big (tq, tk) temporaries are consumed within
        # each iteration so only (tq, hd)-sized pieces stay live.
        for h in range(n_head):
            sl = slice(h * hd, (h + 1) * hd)
            s = lax.dot_general(q[:, sl], k[:, sl],
                                (((1,), (1,)), ((), ())),
                                preferred_element_type=jnp.float32)
            if masked:
                s = jnp.where(causal, s, _NEG_BIG)
            m_p = m_prev[:, h:h + 1]
            m_n = jnp.maximum(m_p, jnp.max(s, axis=-1, keepdims=True))
            alpha = jnp.exp(m_p - m_n)
            pexp = jnp.exp(s - m_n)
            l_cols.append(alpha * l_prev[:, h:h + 1]
                          + jnp.sum(pexp, axis=-1, keepdims=True))
            pv_cols.append(jnp.dot(pexp.astype(v.dtype), v[:, sl],
                                   preferred_element_type=jnp.float32))
            m_cols.append(m_n)
            alpha_cols.append(jnp.broadcast_to(alpha, (tq, hd)))
        # One lane-dense full-width update of the running stats / accumulator.
        m_sc[...] = jnp.concatenate(m_cols, axis=-1)
        l_sc[...] = jnp.concatenate(l_cols, axis=-1)
        acc_sc[...] = (jnp.concatenate(alpha_cols, axis=-1) * acc_sc[...]
                       + jnp.concatenate(pv_cols, axis=-1))

    # Interior tiles (strictly below the diagonal) skip the causal select.
    needs_mask = ki * tk + tk - 1 > qi * tq

    @pl.when(jnp.logical_not(needs_mask))
    def _interior():
        tile_update(masked=False)

    @pl.when(needs_mask)
    def _diagonal():
        tile_update(masked=True)

    @pl.when(ki == ki_last)           # finalize on the last kv tile of a group
    def _finalize():
        l = l_sc[...]
        inv_cols = [jnp.broadcast_to(1.0 / l[:, h:h + 1], (tq, hd))   # exact
                    for h in range(n_head)]
        y = (acc_sc[...] * jnp.concatenate(inv_cols, axis=-1)).astype(jnp.bfloat16)
        attn_out = jnp.dot(y, wap_ref[...],
                           preferred_element_type=jnp.float32) + bap_ref[...]
        x1 = x_ref[0].astype(jnp.float32) + attn_out        # residual 1
        if fuse_mlp:
            h2 = _layernorm(x1, g2_ref[...], b2_ref[...]).astype(jnp.bfloat16)
            f = jnp.dot(h2, wfc_ref[...],
                        preferred_element_type=jnp.float32) + bfc_ref[...]
            f = jax.nn.gelu(f, approximate=True)            # f32 tanh GELU
            mlp = jnp.dot(f.astype(jnp.bfloat16), wmp_ref[...],
                          preferred_element_type=jnp.float32) + bmp_ref[...]
            o_ref[0] = (x1 + mlp).astype(o_ref.dtype)        # residual 2
        else:
            o_ref[0] = x1.astype(o_ref.dtype)


# ---------------------------------------------------------------------------
# Kernel 3 (only when the MLP is split out, e.g. small-VMEM chips / big C):
#           LayerNorm(x1) -> GELU MLP -> residual.
# ---------------------------------------------------------------------------
def _ln_mlp_kernel(x1_ref, g2_ref, b2_ref, wfc_ref, bfc_ref,
                   wmp_ref, bmp_ref, o_ref):
    x1 = x1_ref[0].astype(jnp.float32)
    h2 = _layernorm(x1, g2_ref[...], b2_ref[...]).astype(jnp.bfloat16)
    f = jnp.dot(h2, wfc_ref[...], preferred_element_type=jnp.float32) + bfc_ref[...]
    f = jax.nn.gelu(f, approximate=True)
    mlp = jnp.dot(f.astype(jnp.bfloat16), wmp_ref[...],
                  preferred_element_type=jnp.float32) + bmp_ref[...]
    o_ref[0] = (x1 + mlp).astype(o_ref.dtype)


# ---------------------------------------------------------------------------
# Wrapper
# ---------------------------------------------------------------------------
def block_forward(x, params, n_head, *, q_tile=None, kv_tile=None,
                  force_split_mlp=False):
    B, T, C = x.shape
    assert C % n_head == 0
    hd = C // n_head
    scale = 1.0 / math.sqrt(hd)

    bf16, f32 = jnp.bfloat16, jnp.float32
    out_itemsize = jnp.dtype(x.dtype).itemsize

    vmem_limit, vmem_cap = _vmem_budget()
    buf1 = _buffered1_supported()
    cs = functools.partial(_const_spec, single_buffer=buf1)

    # Generation-aware tile defaults: bigger q tiles on 128-MiB-VMEM chips.
    if q_tile is None:
        q_tile = 512 if vmem_cap >= 96 * 1024 * 1024 else 256
    if kv_tile is None:
        kv_tile = 256
    tq = _pick_tile(T, q_tile)
    tk = _pick_tile(T, kv_tile)
    num_q, num_kv = T // tq, T // tk

    fuse_mlp = (not force_split_mlp) and _fused_attn_mlp_fits(
        C, tq, tk, n_head, out_itemsize, vmem_limit, buf1)

    # ----- parameter prep: bf16 MXU operands, f32 biases / LN params ------
    w_attn = params['w_attn'].astype(f32)
    b_attn = params['b_attn'].astype(f32)
    # Fold 1/sqrt(hd) into the q columns so the kernel never scales scores.
    w_qkv = jnp.concatenate([w_attn[:, :C] * scale, w_attn[:, C:]],
                            axis=1).astype(bf16)                   # (C, 3C)
    b_qkv = jnp.concatenate([b_attn[:, :C] * scale, b_attn[:, C:]], axis=1)
    w_ap = params['w_aproj'].astype(bf16)
    w_fc = params['w_fc'].astype(bf16)
    w_mp = params['w_mproj'].astype(bf16)
    b_ap = params['b_aproj'].astype(f32)
    b_fc = params['b_fc'].astype(f32)
    b_mp = params['b_mproj'].astype(f32)
    g1, be1 = params['g1'].astype(f32), params['beta1'].astype(f32)
    g2, be2 = params['g2'].astype(f32), params['beta2'].astype(f32)

    # ------------------ kernel 1: LN1 + fused qkv projection --------------
    qkv_cost = pl.CostEstimate(
        flops=int(6 * B * T * C * C + 10 * B * T * C),
        transcendentals=int(B * T),
        bytes_accessed=int(4 * B * T * C + 6 * B * T * C + 6 * C * C + 12 * C))

    q, k, v = pl.pallas_call(
        _ln_qkv_kernel,
        out_shape=[jax.ShapeDtypeStruct((B, T, C), bf16)] * 3,
        grid=(B, num_q),
        in_specs=[
            pl.BlockSpec((1, tq, C), lambda b, i: (b, i, 0)),   # x
            cs((1, C)), cs((1, C)),                             # g1, beta1
            cs((C, 3 * C)), cs((1, 3 * C)),                     # w_qkv, b_qkv
        ],
        out_specs=[pl.BlockSpec((1, tq, C), lambda b, i: (b, i, 0))] * 3,
        compiler_params=pltpu.CompilerParams(
            dimension_semantics=("parallel", "parallel"),
            vmem_limit_bytes=vmem_limit),
        cost_estimate=qkv_cost,
    )(x, g1, be1, w_qkv, b_qkv)

    # ---- kernel 2: compact-causal flash attention (+ optional MLP) -------
    sched_q, sched_k = [], []
    for qi in range(num_q):
        ki_last = min(num_kv - 1, (qi * tq + tq - 1) // tk)
        for ki in range(ki_last + 1):
            sched_q.append(qi)
            sched_k.append(ki)
    num_pairs = len(sched_q)
    qi_arr = jnp.asarray(sched_q, jnp.int32)
    ki_arr = jnp.asarray(sched_k, jnp.int32)

    x_spec = pl.BlockSpec((1, tq, C), lambda b, p, qi_r, ki_r: (b, qi_r[p], 0))
    q_spec = pl.BlockSpec((1, tq, C), lambda b, p, qi_r, ki_r: (b, qi_r[p], 0))
    k_spec = pl.BlockSpec((1, tk, C), lambda b, p, qi_r, ki_r: (b, ki_r[p], 0))
    v_spec = pl.BlockSpec((1, tk, C), lambda b, p, qi_r, ki_r: (b, ki_r[p], 0))
    o_spec = pl.BlockSpec((1, tq, C), lambda b, p, qi_r, ki_r: (b, qi_r[p], 0))

    in_specs = [x_spec, q_spec, k_spec, v_spec, cs((C, C)), cs((1, C))]
    operands = [x, q, k, v, w_ap, b_ap]
    if fuse_mlp:
        in_specs += [cs((1, C)), cs((1, C)), cs((C, 4 * C)), cs((1, 4 * C)),
                     cs((4 * C, C)), cs((1, C))]
        operands += [g2, be2, w_fc, b_fc, w_mp, b_mp]

    attn_cost = pl.CostEstimate(
        flops=int(B * num_pairs * 4 * tq * tk * C
                  + B * T * C * C * (2 + (16 if fuse_mlp else 0))),
        transcendentals=int(B * num_pairs * tq * tk * n_head
                            + (B * T * 4 * C if fuse_mlp else 0)),
        bytes_accessed=int(6 * B * T * C
                           + 4 * B * num_pairs * tk * C
                           + 2 * C * C * (9 if fuse_mlp else 1)
                           + B * T * C * out_itemsize))

    attn_out_dtype = x.dtype if fuse_mlp else jnp.float32
    attn_out = pl.pallas_call(
        functools.partial(_attn_kernel, n_head=n_head, tq=tq, tk=tk,
                          num_kv=num_kv, fuse_mlp=fuse_mlp),
        out_shape=jax.ShapeDtypeStruct((B, T, C), attn_out_dtype),
        grid_spec=pltpu.PrefetchScalarGridSpec(
            num_scalar_prefetch=2,
            grid=(B, num_pairs),
            in_specs=in_specs,
            out_specs=o_spec,
            scratch_shapes=[
                pltpu.VMEM((tq, C), jnp.float32),         # per-head output accum
                pltpu.VMEM((tq, n_head), jnp.float32),    # running row max
                pltpu.VMEM((tq, n_head), jnp.float32),    # running row denom
            ]),
        compiler_params=pltpu.CompilerParams(
            dimension_semantics=("parallel", "arbitrary"),
            vmem_limit_bytes=vmem_limit),
        cost_estimate=attn_cost,
    )(qi_arr, ki_arr, *operands)

    if fuse_mlp:
        return attn_out

    # -------------- kernel 3 (split path): LN2 + GELU MLP -----------------
    mlp_cost = pl.CostEstimate(
        flops=int(16 * B * T * C * C + 12 * B * T * C),
        transcendentals=int(B * T * 4 * C + B * T),
        bytes_accessed=int(4 * B * T * C + 16 * C * C
                           + B * T * C * out_itemsize))

    out = pl.pallas_call(
        _ln_mlp_kernel,
        out_shape=jax.ShapeDtypeStruct((B, T, C), x.dtype),
        grid=(B, num_q),
        in_specs=[
            pl.BlockSpec((1, tq, C), lambda b, i: (b, i, 0)),   # x1
            cs((1, C)), cs((1, C)),                             # g2, beta2
            cs((C, 4 * C)), cs((1, 4 * C)),                     # w_fc, b_fc
            cs((4 * C, C)), cs((1, C)),                         # w_mproj, b_mproj
        ],
        out_specs=pl.BlockSpec((1, tq, C), lambda b, i: (b, i, 0)),
        compiler_params=pltpu.CompilerParams(
            dimension_semantics=("parallel", "parallel"),
            vmem_limit_bytes=vmem_limit),
        cost_estimate=mlp_cost,
    )(attn_out, g2, be2, w_fc, b_fc, w_mp, b_mp)
    return out


# ---------------- pure-JAX f32 reference (module semantics) ----------------
def block_reference(x, params, n_head):
    B, T, C = x.shape
    hd = C // n_head

    def ln(v, g, b):
        mu = jnp.mean(v, axis=-1, keepdims=True)
        var = jnp.mean(jnp.square(v - mu), axis=-1, keepdims=True)
        return (v - mu) / jnp.sqrt(var + _LN_EPS) * g + b

    h = ln(x, params['g1'], params['beta1'])
    qkv = h @ params['w_attn'] + params['b_attn']
    q, k, v = jnp.split(qkv, 3, axis=-1)
    q = q.reshape(B, T, n_head, hd).transpose(0, 2, 1, 3)
    k = k.reshape(B, T, n_head, hd).transpose(0, 2, 1, 3)
    v = v.reshape(B, T, n_head, hd).transpose(0, 2, 1, 3)
    att = jnp.einsum('bhtd,bhsd->bhts', q, k) / math.sqrt(hd)
    mask = jnp.tril(jnp.ones((T, T), dtype=bool))
    att = jnp.where(mask[None, None], att, -jnp.inf)
    att = jax.nn.softmax(att, axis=-1)
    y = jnp.einsum('bhts,bhsd->bhtd', att, v).transpose(0, 2, 1, 3).reshape(B, T, C)
    y = y @ params['w_aproj'] + params['b_aproj']
    x = x + y

    h2 = ln(x, params['g2'], params['beta2'])
    f = jax.nn.gelu(h2 @ params['w_fc'] + params['b_fc'], approximate=True)
    return x + (f @ params['w_mproj'] + params['b_mproj'])


if __name__ == "__main__":
    def make_params(key, C):
        ks = jax.random.split(key, 12)
        return {
            'w_attn':  0.02 * jax.random.normal(ks[0], (C, 3 * C), jnp.float32),
            'b_attn':  0.01 * jax.random.normal(ks[1], (1, 3 * C), jnp.float32),
            'w_aproj': 0.02 * jax.random.normal(ks[2], (C, C), jnp.float32),
            'b_aproj': 0.01 * jax.random.normal(ks[3], (1, C), jnp.float32),
            'g1':      1.0 + 0.1 * jax.random.normal(ks[4], (1, C), jnp.float32),
            'beta1':   0.1 * jax.random.normal(ks[5], (1, C), jnp.float32),
            'g2':      1.0 + 0.1 * jax.random.normal(ks[6], (1, C), jnp.float32),
            'beta2':   0.1 * jax.random.normal(ks[7], (1, C), jnp.float32),
            'w_fc':    0.02 * jax.random.normal(ks[8], (C, 4 * C), jnp.float32),
            'b_fc':    0.01 * jax.random.normal(ks[9], (1, 4 * C), jnp.float32),
            'w_mproj': 0.02 * jax.random.normal(ks[10], (4 * C, C), jnp.float32),
            'b_mproj': 0.01 * jax.random.normal(ks[11], (1, C), jnp.float32),
        }

    # (B, T, C, n_head, q_tile, kv_tile, force_split_mlp):
    #   case 1: single tile (fused epilogue)
    #   case 2: multiple q/kv tiles -> compact causal schedule, masked +
    #           unmasked paths, online softmax across tiles (fused epilogue)
    #   case 3: lane-aligned shape, MLP forcibly split into its own kernel
    cases = [
        (2, 8, 32, 4, 8, 8, False),
        (2, 32, 32, 4, 16, 16, False),
        (1, 256, 128, 4, 128, 128, True),
    ]

    for (B, T, C, n_head, tq, tk, force_split) in cases:
        key = jax.random.PRNGKey(0)
        kp, kx = jax.random.split(key)
        params = make_params(kp, C)
        x = jax.random.normal(kx, (B, T, C), jnp.float32)

        out = jax.block_until_ready(
            block_forward(x, params, n_head, q_tile=tq, kv_tile=tk,
                          force_split_mlp=force_split))
        ref = block_reference(x, params, n_head)

        # bf16 MXU operands -> compare with relaxed tolerance
        assert out.shape == ref.shape
        err = jnp.max(jnp.abs(out - ref))
        assert jnp.allclose(out, ref, rtol=2e-2, atol=2e-2), (
            f"mismatch vs reference (B={B},T={T},C={C}), max err = {err}")

    print("KERNEL_OK")
</pallas_src>

<mosaic_0001>
module attributes {stable_mosaic.version = 11 : i64} {
  func.func @_k(%arg0: i32, %arg1: memref<8x128xf32, #tpu.memory_space<vmem>>, %arg2: memref<8x128xf32, #tpu.memory_space<vmem>>, %arg3: memref<8x128xf32, #tpu.memory_space<vmem>>) attributes {dimension_semantics = [#tpu.dimension_semantics<arbitrary>], iteration_bounds = array<i64: 2>, scalar_prefetch = 0 : i64, scratch_operands = 0 : i64, tpu.core_type = #tpu.core_type<tc>, window_params = [{pipeline_mode = #tpu.pipeline_mode<synchronous>, transform_indices = @transform_0, window_bounds = array<i64: 8, 128>}, {transform_indices = @transform_1, window_bounds = array<i64: 8, 128>}, {transform_indices = @transform_2, window_bounds = array<i64: 8, 128>}]} {
    %c0 = arith.constant 0 : index
    %c0_0 = arith.constant 0 : index
    %0 = vector.load %arg2[%c0, %c0_0] : memref<8x128xf32, #tpu.memory_space<vmem>>, vector<8x128xf32>
    %c0_1 = arith.constant 0 : index
    %c0_2 = arith.constant 0 : index
    %1 = vector.load %arg1[%c0_1, %c0_2] : memref<8x128xf32, #tpu.memory_space<vmem>>, vector<8x128xf32>
    %2 = arith.addf %0, %1 : vector<8x128xf32>
    %c0_3 = arith.constant 0 : index
    %c0_4 = arith.constant 0 : index
    %3 = vector.load %arg3[%c0_3, %c0_4] : memref<8x128xf32, #tpu.memory_space<vmem>>, vector<8x128xf32>
    tpu.vector_store %arg3[%c0_3, %c0_4], %2 {strides = array<i32>} : memref<8x128xf32, #tpu.memory_space<vmem>>, vector<8x128xf32>,
    return
  }
  func.func @transform_0(%arg0: i32) -> (i32, i32) {
    %c0_i32 = arith.constant 0 : i32
    %c0_i32_0 = arith.constant 0 : i32
    %c0_i32_1 = arith.constant 0 : i32
    return %c0_i32, %c0_i32_0 : i32, i32
  }
  func.func @transform_1(%arg0: i32) -> (i32, i32) {
    %c0_i32 = arith.constant 0 : i32
    %c0_i32_0 = arith.constant 0 : i32
    return %arg0, %c0_i32 : i32, i32
  }
  func.func @transform_2(%arg0: i32) -> (i32, i32) {
    %c0_i32 = arith.constant 0 : i32
    %c0_i32_0 = arith.constant 0 : i32
    return %arg0, %c0_i32 : i32, i32
  }
}

module attributes {stable_mosaic.version = 11 : i64} {
  func.func @_ln_qkv_kernel(%arg0: i32, %arg1: i32, %arg2: memref<1x8x32xf32, #tpu.memory_space<vmem>>, %arg3: memref<1x32xf32, #tpu.memory_space<vmem>>, %arg4: memref<1x32xf32, #tpu.memory_space<vmem>>, %arg5: memref<32x96xbf16, #tpu.memory_space<vmem>>, %arg6: memref<1x96xf32, #tpu.memory_space<vmem>>, %arg7: memref<1x8x32xbf16, #tpu.memory_space<vmem>>, %arg8: memref<1x8x32xbf16, #tpu.memory_space<vmem>>, %arg9: memref<1x8x32xbf16, #tpu.memory_space<vmem>>) attributes {dimension_semantics = [#tpu.dimension_semantics<parallel>, #tpu.dimension_semantics<parallel>], iteration_bounds = array<i64: 2, 1>, scalar_prefetch = 0 : i64, scratch_operands = 0 : i64, tpu.core_type = #tpu.core_type<tc>, window_params = [{transform_indices = @transform_0, window_bounds = array<i64: 1, 8, 32>}, {pipeline_mode = #tpu.pipeline_mode<synchronous>, transform_indices = @transform_1, window_bounds = array<i64: 1, 32>}, {pipeline_mode = #tpu.pipeline_mode<synchronous>, transform_indices = @transform_2, window_bounds = array<i64: 1, 32>}, {pipeline_mode = #tpu.pipeline_mode<synchronous>, transform_indices = @transform_3, window_bounds = array<i64: 32, 96>}, {pipeline_mode = #tpu.pipeline_mode<synchronous>, transform_indices = @transform_4, window_bounds = array<i64: 1, 96>}, {transform_indices = @transform_5, window_bounds = array<i64: 1, 8, 32>}, {transform_indices = @transform_6, window_bounds = array<i64: 1, 8, 32>}, {transform_indices = @transform_7, window_bounds = array<i64: 1, 8, 32>}]} {
    %c0 = arith.constant 0 : index
    %c0_0 = arith.constant 0 : index
    %c0_1 = arith.constant 0 : index
    %0 = vector.load %arg2[%c0, %c0_0, %c0_1] : memref<1x8x32xf32, #tpu.memory_space<vmem>>, vector<1x8x32xf32>
    %1 = vector.shape_cast %0 : vector<1x8x32xf32> to vector<8x32xf32>
    %c0_2 = arith.constant 0 : index
    %c0_3 = arith.constant 0 : index
    %2 = vector.load %arg3[%c0_2, %c0_3] : memref<1x32xf32, #tpu.memory_space<vmem>>, vector<1x32xf32>
    %c0_4 = arith.constant 0 : index
    %c0_5 = arith.constant 0 : index
    %3 = vector.load %arg4[%c0_4, %c0_5] : memref<1x32xf32, #tpu.memory_space<vmem>>, vector<1x32xf32>
    %cst = arith.constant dense<0.000000e+00> : vector<8xf32>
    %4 = vector.multi_reduction <add>, %1, %cst [1] : vector<8x32xf32> to vector<8xf32>
    %5 = vector.shape_cast %4 : vector<8xf32> to vector<8x1xf32>
    %cst_6 = arith.constant 3.200000e+01 : f32
    %6 = vector.broadcast %cst_6 : f32 to vector<8x1xf32>
    %7 = arith.divf %5, %6 : vector<8x1xf32>
    %8 = vector.broadcast %7 : vector<8x1xf32> to vector<8x32xf32>
    %9 = arith.subf %1, %8 : vector<8x32xf32>
    %10 = arith.mulf %9, %9 : vector<8x32xf32>
    %cst_7 = arith.constant dense<0.000000e+00> : vector<8xf32>
    %11 = vector.multi_reduction <add>, %10, %cst_7 [1] : vector<8x32xf32> to vector<8xf32>
    %12 = vector.shape_cast %11 : vector<8xf32> to vector<8x1xf32>
    %cst_8 = arith.constant 3.200000e+01 : f32
    %13 = vector.broadcast %cst_8 : f32 to vector<8x1xf32>
    %14 = arith.divf %12, %13 : vector<8x1xf32>
    %cst_9 = arith.constant 9.99999974E-6 : f32
    %15 = vector.broadcast %cst_9 : f32 to vector<8x1xf32>
    %16 = arith.addf %14, %15 : vector<8x1xf32>
    %17 = math.rsqrt %16 : vector<8x1xf32>
    %18 = vector.broadcast %7 : vector<8x1xf32> to vector<8x32xf32>
    %19 = arith.subf %1, %18 : vector<8x32xf32>
    %20 = vector.broadcast %17 : vector<8x1xf32> to vector<8x32xf32>
    %21 = arith.mulf %19, %20 : vector<8x32xf32>
    %22 = vector.broadcast %2 : vector<1x32xf32> to vector<8x32xf32>
    %23 = arith.mulf %21, %22 : vector<8x32xf32>
    %24 = vector.broadcast %3 : vector<1x32xf32> to vector<8x32xf32>
    %25 = arith.addf %23, %24 : vector<8x32xf32>
    %26 = arith.truncf %25 : vector<8x32xf32> to vector<8x32xbf16>
    %c0_10 = arith.constant 0 : index
    %c0_11 = arith.constant 0 : index
    %27 = vector.load %arg5[%c0_10, %c0_11] : memref<32x96xbf16, #tpu.memory_space<vmem>>, vector<32x96xbf16>
    %cst_12 = arith.constant dense<0.000000e+00> : vector<8x96xf32>
    %28 = tpu.matmul %26, %27, %cst_12 {dimension_numbers = #tpu.dot_dimension_numbers<[1], [0], [0], [1], [0, 0, 1, 1], [], []>} : vector<8x32xbf16>, vector<32x96xbf16>, vector<8x96xf32> -> vector<8x96xf32>
    %c0_13 = arith.constant 0 : index
    %c0_14 = arith.constant 0 : index
    %29 = vector.load %arg6[%c0_13, %c0_14] : memref<1x96xf32, #tpu.memory_space<vmem>>, vector<1x96xf32>
    %30 = vector.broadcast %29 : vector<1x96xf32> to vector<8x96xf32>
    %31 = arith.addf %28, %30 : vector<8x96xf32>
    %32 = vector.extract_strided_slice %31 {offsets = [0, 0], sizes = [8, 32], strides = [1, 1]} : vector<8x96xf32> to vector<8x32xf32>
    %33 = arith.truncf %32 : vector<8x32xf32> to vector<8x32xbf16>
    %c0_15 = arith.constant 0 : index
    %c0_16 = arith.constant 0 : index
    %c0_17 = arith.constant 0 : index
    %34 = vector.load %arg7[%c0_15, %c0_16, %c0_17] : memref<1x8x32xbf16, #tpu.memory_space<vmem>>, vector<1x8x32xbf16>
    %35 = vector.shape_cast %34 : vector<1x8x32xbf16> to vector<8x32xbf16>
    %36 = vector.shape_cast %33 : vector<8x32xbf16> to vector<1x8x32xbf16>
    tpu.vector_store %arg7[%c0_15, %c0_16, %c0_17], %36 {strides = array<i32>} : memref<1x8x32xbf16, #tpu.memory_space<vmem>>, vector<1x8x32xbf16>,
    %37 = vector.extract_strided_slice %31 {offsets = [0, 32], sizes = [8, 32], strides = [1, 1]} : vector<8x96xf32> to vector<8x32xf32>
    %38 = arith.truncf %37 : vector<8x32xf32> to vector<8x32xbf16>
    %c0_18 = arith.constant 0 : index
    %c0_19 = arith.constant 0 : index
    %c0_20 = arith.constant 0 : index
    %39 = vector.load %arg8[%c0_18, %c0_19, %c0_20] : memref<1x8x32xbf16, #tpu.memory_space<vmem>>, vector<1x8x32xbf16>
    %40 = vector.shape_cast %39 : vector<1x8x32xbf16> to vector<8x32xbf16>
    %41 = vector.shape_cast %38 : vector<8x32xbf16> to vector<1x8x32xbf16>
    tpu.vector_store %arg8[%c0_18, %c0_19, %c0_20], %41 {strides = array<i32>} : memref<1x8x32xbf16, #tpu.memory_space<vmem>>, vector<1x8x32xbf16>,
    %42 = vector.extract_strided_slice %31 {offsets = [0, 64], sizes = [8, 32], strides = [1, 1]} : vector<8x96xf32> to vector<8x32xf32>
    %43 = arith.truncf %42 : vector<8x32xf32> to vector<8x32xbf16>
    %c0_21 = arith.constant 0 : index
    %c0_22 = arith.constant 0 : index
    %c0_23 = arith.constant 0 : index
    %44 = vector.load %arg9[%c0_21, %c0_22, %c0_23] : memref<1x8x32xbf16, #tpu.memory_space<vmem>>, vector<1x8x32xbf16>
    %45 = vector.shape_cast %44 : vector<1x8x32xbf16> to vector<8x32xbf16>
    %46 = vector.shape_cast %43 : vector<8x32xbf16> to vector<1x8x32xbf16>
    tpu.vector_store %arg9[%c0_21, %c0_22, %c0_23], %46 {strides = array<i32>} : memref<1x8x32xbf16, #tpu.memory_space<vmem>>, vector<1x8x32xbf16>,
    return
  }
  func.func @transform_0(%arg0: i32, %arg1: i32) -> (i32, i32, i32) {
    %c0_i32 = arith.constant 0 : i32
    %c0_i32_0 = arith.constant 0 : i32
    return %arg0, %arg1, %c0_i32 : i32, i32, i32
  }
  func.func @transform_1(%arg0: i32, %arg1: i32) -> (i32, i32) {
    %c0_i32 = arith.constant 0 : i32
    %c0_i32_0 = arith.constant 0 : i32
    %c0_i32_1 = arith.constant 0 : i32
    return %c0_i32, %c0_i32_0 : i32, i32
  }
  func.func @transform_2(%arg0: i32, %arg1: i32) -> (i32, i32) {
    %c0_i32 = arith.constant 0 : i32
    %c0_i32_0 = arith.constant 0 : i32
    %c0_i32_1 = arith.constant 0 : i32
    return %c0_i32, %c0_i32_0 : i32, i32
  }
  func.func @transform_3(%arg0: i32, %arg1: i32) -> (i32, i32) {
    %c0_i32 = arith.constant 0 : i32
    %c0_i32_0 = arith.constant 0 : i32
    %c0_i32_1 = arith.constant 0 : i32
    return %c0_i32, %c0_i32_0 : i32, i32
  }
  func.func @transform_4(%arg0: i32, %arg1: i32) -> (i32, i32) {
    %c0_i32 = arith.constant 0 : i32
    %c0_i32_0 = arith.constant 0 : i32
    %c0_i32_1 = arith.constant 0 : i32
    return %c0_i32, %c0_i32_0 : i32, i32
  }
  func.func @transform_5(%arg0: i32, %arg1: i32) -> (i32, i32, i32) {
    %c0_i32 = arith.constant 0 : i32
    %c0_i32_0 = arith.constant 0 : i32
    return %arg0, %arg1, %c0_i32 : i32, i32, i32
  }
  func.func @transform_6(%arg0: i32, %arg1: i32) -> (i32, i32, i32) {
    %c0_i32 = arith.constant 0 : i32
    %c0_i32_0 = arith.constant 0 : i32
    return %arg0, %arg1, %c0_i32 : i32, i32, i32
  }
  func.func @transform_7(%arg0: i32, %arg1: i32) -> (i32, i32, i32) {
    %c0_i32 = arith.constant 0 : i32
    %c0_i32_0 = arith.constant 0 : i32
    return %arg0, %arg1, %c0_i32 : i32, i32, i32
  }
}

</mosaic_0001>

<bundles_post_ra>
// kernel: tpu_custom_call.1
= control target key start
LH: loop header
LB: loop body
LE: loop exit
PB: predicated region body
PF: predicated region fallthrough
CT: control target
= control target key end

     0   :  { %7 = vsyncpa [#allocation3], 0  ;;  %s635_s0 = inlined_call_operand.hbm [shape: f32[8,128], index: 0, kind: input, shape index: {}]   ;;  %s636_s1 = inlined_call_operand.hbm [shape: f32[16,128], index: 1, kind: input, shape index: {}]   ;;  %s637_s2 = inlined_call_operand.hbm [shape: f32[16,128], index: 2, kind: output, shape index: {}]  }
   0x1   :  { %8 = vsyncpa [#allocation6], 0 }
   0x2   :  { %10 = vsyncpa [#allocation6 + $0x1], 0 }
   0x3   :  { %11 = vsyncpa [#allocation4], 0 }
   0x4   :  { %13 = vsyncpa [#allocation4 + $0x1], 0  ;;  %s497_s9 = smov 0   ;;  %s499_s10 = smov 0  }
   0x5   :  { %s501_s11 = smov 0   ;;  %s503_s12 = smov 0  }
   0x6 LB: > { %s518_s13 = sadd.s32 4294967295, %s479_s12   ;;  %s278_s14 = sadd.s32 4294967294, %s479_s12   ;;  %s479_s12 = sphi %s503_s12, %s647_s12   ;;  %s475_s11 = sphi %s501_s11, %s646_s11   ;;  %s471_s10 = sphi %s499_s10, %s645_s10   ;;  %s467_s9 = sphi %s497_s9, %s644_s9  }
   0x7   : > { %p60_p0 = scmp.ne.s32.totalorder %s471_s10, %s467_s9  ;;  %p61_p1 = scmp.eq.s32.totalorder %s518_s13, 0 }
   0x8   : > { %p84_p2 = scmp.eq.s32.totalorder %s518_s13, 1  ;;  %p90_p3 = scmp.eq.s32.totalorder %s278_s14, 1 }
   0x9   : > { %p527_p4 = por %p61_p1, %p60_p0  ;;  %p279_p5 = scmp.ge.s32.totalorder %s479_s12, 1 }
   0xa   : > { %p532_p6 = por %p90_p3, %p60_p0  ;;  %p97_p7 = scmp.lt.s32.totalorder %s479_s12, 3 }
   0xb   : > { %s109_s19 = sshll.u32 %s635_s0, 4  ;;  %s481_s21 = smov [#allocation2]   ;;  %s110_s19 = int_to_ptr.hbm [resolvable:$true] %s109_s19 }
   0xc   : > { %p540_p8 = pnand %p279_p5, %p97_p7  ;;  %s111_s22 = sshll.u32 %s481_s21, 4  ;;  %s112_s22 = int_to_ptr.vmem [resolvable:$true] %s111_s22 }
   0xd   : > { %s550_s23 = sadd.s32 1, %s479_s12   ;;  %s47_s24 = sadd.s32 1, %s475_s11 }
   0xe   : > { %p300_p10 = pneg %p540_p8  ;;  %s44_s25 = ssub.s32 %s479_s12, %s550_s23 }
   0xf   : > { %p45_p12 = scmp.eq.s32.totalorder %s44_s25, 0  ;;  %p54_p13 = scmp.ne.s32.totalorder %s475_s11, %s471_s10 }
  0x10   : > { %p301_p11 = pnand %p300_p10, %p61_p1  ;;  %p55_p0 = scmp.eq.s32.totalorder %s479_s12, 0 }
  0x11   : > { %s559_s26 = scalar_select %p45_p12, %s475_s11, %s47_s24  }
  0x12   : > { %303 = dma.hbm_to_vmem [thread:$0]  (!%p301_p11), %s110_s19, 128, %s112_s22, [#allocation3]  }
  0x13   : > { %p563_p3 = por %p84_p2, %p54_p13  ;;  %p313_p5 = scmp.lt.s32.totalorder %s479_s12, 2 }
  0x14   : > { %s122_s28 = sand.u32 1, %s475_s11   ;;  %s283_s29 = sshll.u32 %s479_s12, 3 }
  0x15   : > { %p56_p7 = por %p55_p0, %p54_p13  ;;  %s282_s30 = sshll.u32 %s122_s28, 3 }
  0x16   : > { %s130_s5 = scalar_lea.hbm %s636_s1, %s283_s29  ;;  %s126_s7 = scalar_lea.vmem [#allocation5], %s282_s30 }
  0x17   : > { %s132_s6 = sshll.u32 %s130_s5, 4  ;;  %s134_s8 = sshll.u32 %s126_s7, 4  ;;  %s133_s6 = int_to_ptr.hbm [resolvable:$true] %s132_s6  ;;  %s135_s8 = int_to_ptr.vmem [resolvable:$true] %s134_s8 }
  0x18   : > { %p573_p10 = pnand %p313_p5, %p56_p7  ;;  %s123_s17 = scalar_lea.sflag [#allocation6], %s122_s28 }
  0x19   : > { %s379_s18 = sshra.s32 %s133_s6, 4  ;;  %s386_s24 = scalar_lea.hbm %s636_s1, 16  ;;  %s380_s18 = int_to_ptr.hbm [resolvable:$true] %s379_s18 }
  0x1a   : > { %s381_s19 = scalar_lea.hbm %s380_s18, 8  ;;  %p383_p11 = pneg %p573_p10 }
  0x1b   : > { %p382_p2 = scmp.ne.s32.totalorder %s380_s18, %s381_s19  ;;  %p387_p0 = scmp.lt.s32.totalorder %s380_s18, %s636_s1 }
  0x1c   : > { %p388_p5 = scmp.lt.s32.totalorder %s386_s24, %s381_s19 }
  0x1d   : > { %p384_p12 = pnand %p383_p11, %p382_p2 }
  0x1e   : > { %p389_p7 = por %p388_p5, %p387_p0 }
  0x1f   : > { %p385_p13 = pneg %p384_p12 }
  0x21   : > { %p390_p9 = pnand %p389_p7, %p385_p13 }
  0x23   : > { %393 = shalt.err (!%p390_p9)
}
  0x24   : > { %307 = dma.hbm_to_vmem [thread:$0]  (!%p573_p10), %s133_s6, 128, %s135_s8, %s123_s17  }
  0x25   : > { %143 = sbr.rel (%p540_p8) target bundleno = 62 (0x3e), region = 28 }
  0x2a   : > { %454 = dma.done.wait (%p61_p1), [#allocation3], 128  }
  0x2b   : > { %456 = vsyncadd (%p61_p1), [#allocation3], 4294967168  ;;  %s594_s28 = sand.u32 1, %s471_s10  }
  0x2c   : > { %s286_s30 = sshll.u32 %s594_s28, 3  ;;  %s151_s3 = scalar_lea.sflag [#allocation6], %s594_s28 }
  0x2d   : > { %s154_s4 = scalar_lea.vmem [#allocation5], %s286_s30 }
  0x2e   : > { %458 = dma.done.wait (%p527_p4), %s151_s3, 128  }
  0x2f   : > { %460 = vsyncadd (%p527_p4), %s151_s3, 4294967168  ;;  %s289_s20 = sshll.u32 %s518_s13, 3  ;;  %s175_s8 = scalar_lea.vmem [#allocation7], %s286_s30  ;;  %v176_v0 = vld [vmem:[%s154_s4] sm:$0xff]  ;;  %v177_v1 = vld [vmem:[#allocation2] sm:$0xff] }
  0x30   : > { %s191_s7 = scalar_lea.hbm %s637_s2, %s289_s20  ;;  %s193_s14 = sshll.u32 %s175_s8, 4  ;;  %v178_v2 = vadd.f32 %v177_v1, %v176_v0  ;;  %s194_s14 = int_to_ptr.vmem [resolvable:$true] %s193_s14 }
  0x31   : > { %s195_s17 = sshll.u32 %s191_s7, 4  ;;  %s181_s18 = scalar_lea.sflag [#allocation4], %s594_s28  ;;  %s196_s17 = int_to_ptr.hbm [resolvable:$true] %s195_s17 }
  0x32   : > { %179 = vst [vmem:[%s175_s8] sm:$0xff] %v178_v2  ;;  %s423_s15 = sshra.s32 %s196_s17, 4  ;;  %s429_s22 = scalar_lea.hbm %s637_s2, 16  ;;  %s424_s15 = int_to_ptr.hbm [resolvable:$true] %s423_s15 }
  0x33   : > { %s425_s19 = scalar_lea.hbm %s424_s15, 8  ;;  %p430_p9 = scmp.lt.s32.totalorder %s424_s15, %s637_s2 }
  0x34   : > { %p426_p1 = scmp.ne.s32.totalorder %s424_s15, %s425_s19  ;;  %p431_p10 = scmp.lt.s32.totalorder %s429_s22, %s425_s19 }
  0x36   : > { %p427_p4 = pnand %p426_p1, %p563_p3  ;;  %p432_p2 = por %p431_p10, %p430_p9 }
  0x38   : > { %p428_p8 = pneg %p427_p4 }
  0x3a   : > { %p433_p11 = pnand %p432_p2, %p428_p8 }
  0x3c   : > { %436 = shalt.err (!%p433_p11)
}
  0x3d   : > { %298 = dma.vmem_to_hbm [thread:$0]  (%p563_p3), %s194_s14, 128, %s196_s17, %s181_s18  }
  0x3e PF: > { %s207_s29 = sand.u32 1, %s467_s9   ;;  %p643_p12 = scmp.ge.s32.totalorder %s479_s12, 2 }
  0x3f   : > { %s208_s28 = scalar_lea.sflag [#allocation4], %s207_s29 }
  0x40   : > { %p309_p13 = pnand %p643_p12, %p532_p6 }
  0x42   : > { %p310_p0 = pneg %p309_p13 }
  0x44   : > { %462 = dma.done.wait (%p310_p0), %s208_s28, 128  }
  0x45   : > { %464 = vsyncadd (%p310_p0), %s208_s28, 4294967168  ;;  %p16_p5 = scmp.ge.s32.totalorder %s550_s23, 4   ;;  %s644_s9 = smov %s471_s10 }
  0x46   : > { %s645_s10 = smov %s475_s11  ;;  %s646_s11 = smov %s559_s26 }
  0x47   : > { %s647_s12 = smov %s550_s23  ;;  %18 = sbr.rel (!%p16_p5) target bundleno = 6 (0x6), region = 78 }
  0x4c   :  { %214 = vsyncpa [#allocation3], 1 }
  0x4d   :  { %216 = vsyncpa [#allocation3 + $0x1], 1 }
  0x4e   :  { %217 = vsyncpa [#allocation6], 1 }
  0x4f   :  { %219 = vsyncpa [#allocation6 + $0x1], 1 }
  0x50   :  { %220 = vsyncpa [#allocation4], 1 }
  0x51   :  { %222 = vsyncpa [#allocation4 + $0x1], 1 }

// kernel: tpu_custom_call.1
= control target key start
LH: loop header
LB: loop body
LE: loop exit
PB: predicated region body
PF: predicated region fallthrough
CT: control target
= control target key end

     0   :  { %s1302_s0 = inlined_call_operand.hbm [shape: f32[2,8,32], index: 0, kind: input, shape index: {}]   ;;  %s1303_s1 = inlined_call_operand.hbm [shape: f32[1,32], index: 1, kind: input, shape index: {}]   ;;  %s1304_s2 = inlined_call_operand.vmem [shape: f32[1,32], index: 2, kind: input, shape index: {}]   ;;  %s1305_s3 = inlined_call_operand.hbm [shape: bf16[32,96], index: 3, kind: input, shape index: {}]   ;;  %s1306_s4 = inlined_call_operand.vmem [shape: f32[1,96], index: 4, kind: input, shape index: {}]   ;;  %s1307_s5 = inlined_call_operand.hbm [shape: bf16[2,8,32], index: 5, kind: output, shape index: {0}]   ;;  %s1308_s6 = inlined_call_operand.hbm [shape: bf16[2,8,32], index: 6, kind: output, shape index: {1}]   ;;  %s1309_s7 = inlined_call_operand.hbm [shape: bf16[2,8,32], index: 7, kind: output, shape index: {2}]  }
   0x1   :  { %1311 = sst [smem:[#allocation16_spill]] %s1302_s0 }
   0x2   :  { %1312 = sst [smem:[#allocation17_spill]] %s1303_s1 }
   0x3   :  { %1313 = sst [smem:[#allocation18_spill]] %s1305_s3 }
   0x4   :  { %13 = vsyncpa [#allocation3], 0 }
   0x5   :  { %15 = vsyncpa [#allocation3 + $0x1], 0 }
   0x6   :  { %16 = vsyncpa [#allocation6], 0 }
   0x7   :  { %17 = vsyncpa [#allocation4], 0 }
   0x8   :  { %19 = vsyncpa [#allocation4 + $0x1], 0 }
   0x9   :  { %20 = vsyncpa [#allocation10], 0 }
   0xa   :  { %22 = vsyncpa [#allocation10 + $0x1], 0  ;;  %s1102_s24 = smov 0   ;;  %s1104_s25 = smov 0  }
   0xb   :  { %s1106_s26 = smov 0   ;;  %s1108_s27 = smov 0  }
   0xc   :  { %s1110_s28 = smov 0   ;;  %s1112_s29 = smov 0  }
   0xd LB: > { %s1133_s30 = sadd.s32 4294967295, %s1053_s29   ;;  %s1310_s8 = sadd.s32 4294967294, %s1053_s29   ;;  %s1053_s29 = sphi %s1112_s29, %s28_s29   ;;  %s1049_s28 = sphi %s1110_s28, %s1326_s28   ;;  %s1045_s27 = sphi %s1108_s27, %s1325_s27   ;;  %s1041_s26 = sphi %s1106_s26, %s1324_s26   ;;  %s1037_s25 = sphi %s1104_s25, %s1323_s25   ;;  %s1033_s24 = sphi %s1102_s24, %s1322_s24  }
   0xe   : > { %p62_p0 = scmp.ne.s32.totalorder %s1037_s25, %s1033_s24  ;;  %p63_p1 = scmp.eq.s32.totalorder %s1133_s30, 0 }
   0xf   : > { %p178_p2 = scmp.eq.s32.totalorder %s1310_s8, 1  ;;  %p680_p4 = scmp.ge.s32.totalorder %s1053_s29, 1 }
  0x10   : > { %p1143_p3 = por %p63_p1, %p62_p0  ;;  %p241_p6 = scmp.lt.s32.totalorder %s1053_s29, 3 }
  0x11   : > { %p1148_p5 = por %p178_p2, %p62_p0  ;;  %s1316_s1 = sld [smem:[#allocation17_spill]] }
  0x12   : > { %p1156_p7 = pnand %p680_p4, %p241_p6  ;;  %p683_p8 = scmp.ge.s32.totalorder %s1053_s29, 2 }
  0x13   : > { %s1055_s15 = smov [#allocation5]   ;;  %s1318_s3 = sld [smem:[#allocation18_spill]] }
  0x14   : > { %p728_p9 = pneg %p1156_p7  ;;  %s255_s16 = sshll.u32 %s1055_s15, 4  ;;  %s256_s16 = int_to_ptr.vmem [resolvable:$true] %s255_s16 }
  0x15   : > { %s1056_s20 = smov [#allocation7]   ;;  %s1057_s22 = smov 64  }
  0x16   : > { %p729_p10 = pnand %p728_p9, %p63_p1  ;;  %s269_s21 = sshll.u32 %s1056_s20, 4  ;;  %s270_s21 = int_to_ptr.vmem [resolvable:$true] %s269_s21 }
  0x17   : > { %s253_s13 = sshll.u32 %s1316_s1, 4  ;;  %s1058_s23 = smov 4   ;;  %s254_s13 = int_to_ptr.hbm [resolvable:$true] %s253_s13 }
  0x18   : > { %731 = dma.hbm_to_vmem [thread:$0]  (!%p729_p10), %s254_s13, 16, %s256_s16, [#allocation6]  }
  0x19   : > { %s267_s19 = sshll.u32 %s1318_s3, 4  ;;  %p172_p11 = scmp.eq.s32.totalorder %s1133_s30, 1  ;;  %s268_s19 = int_to_ptr.hbm [resolvable:$true] %s267_s19 }
  0x1a   : > { %734 = dma.hbm_to_vmem [thread:$0]  (!%p729_p10), %s268_s19, 256, %s270_s21, [#allocation6], %s1057_s22, %s1057_s22, %s1058_s23  }
  0x1b   : > { %s40_s11 = sadd.s32 1, %s1049_s28  ;;  %s49_s12 = sadd.s32 1, %s1041_s26 }
  0x1c   : > { %p42_p12 = scmp.ge.s32.totalorder %s40_s11, 2  ;;  %p56_p13 = scmp.ne.s32.totalorder %s1041_s26, %s1037_s25 }
  0x1d   : > { %p57_p0 = scmp.eq.s32.totalorder %s1053_s29, 0  ;;  %p751_p4 = scmp.lt.s32.totalorder %s1053_s29, 2 }
  0x1e   : > { %s1328_s11 = smov (%p42_p12, %s40_s11), 0  ;;  %p1176_p2 = por %p172_p11, %p56_p13 }
  0x1f   : > { %s44_s13 = ssub.s32 %s1049_s28, %s1328_s11  ;;  %s286_s16 = sand.u32 1, %s1041_s26  }
  0x20   : > { %p47_p6 = scmp.eq.s32.totalorder %s44_s13, 0  ;;  %p58_p9 = por %p57_p0, %p56_p13 }
  0x21   : > { %s684_s17 = sshll.u32 %s286_s16, 3  ;;  %s685_s18 = sshll.u32 %s1049_s28, 3 }
  0x22   : > { %s1186_s19 = scalar_select %p47_p6, %s1041_s26, %s49_s12  }
  0x23   : > { %s1320_s0 = sld [smem:[#allocation16_spill]]  ;;  %s290_s8 = scalar_lea.vmem [#allocation2], %s684_s17 }
  0x24   : > { %s299_s1 = sshll.u32 %s290_s8, 4  ;;  %p736_p10 = pnand %p751_p4, %p58_p9  ;;  %s300_s1 = int_to_ptr.vmem [resolvable:$true] %s299_s1 }
  0x25   : > { %s287_s3 = scalar_lea.sflag [#allocation3], %s286_s16  ;;  %s1196_s12 = sand.u32 (!%p1156_p7), 1, %s1037_s25  }
  0x26   : > { %s687_s13 = sshll.u32 (!%p1156_p7), %s1196_s12, 3 }
  0x27   : > { %308 = sbr.rel (%p1156_p7) target bundleno = 579 (0x243), region = 40  ;;  %s314_s20 = scalar_lea.vmem (!%p1156_p7), [#allocation2], %s687_s13 }
  0x29   : > { %s295_s22 = scalar_lea.hbm %s1320_s0, %s685_s18  ;;  %s311_s18 = scalar_lea.sflag (!%p1156_p7), [#allocation3], %s1196_s12 }
  0x2a   : > { %s297_s23 = sshll.u32 %s295_s22, 4  ;;  %s298_s23 = int_to_ptr.hbm [resolvable:$true] %s297_s23 }
  0x2b   : > { %738 = dma.hbm_to_vmem [thread:$0]  (!%p736_p10), %s298_s23, 128, %s300_s1, %s287_s3  }
  0x2c   : > { %1016 = dma.done.wait (%p1143_p3), %s311_s18, 128  }
  0x2d   : > { %1018 = vsyncadd (%p1143_p3), %s311_s18, 4294967168 }
  0x2e   : > { %1020 = dma.done.wait (%p63_p1), [#allocation6], 272  }
  0x2f   : > { %1022 = vsyncadd (%p63_p1), [#allocation6], 4294967024  ;;  %vm370_vm0 = vcmask 261120   ;;  %v367_v0 = vld [vmem:[%s314_s20] sm:$0xff]  ;;  %v1059_v2 = vmov 32.0   ;;  %v710_v15 = vld [vmem:[#allocation7] sm:$0xff] }
  0x30   : > { %v371_v1 = vsel %vm370_vm0, %v367_v0, 0.0  ;;  %813 = vrcp.f32 %v1059_v2  ;;  %v711_v14 = vld [vmem:[#allocation7 + $0x8] sm:$0xff]  ;;  %v810_v25 = vld [vmem:[#allocation5] ss:$0 sm:$0xff]  ;;  %s1218_s14 = sshll.u32 %s1196_s12, 2  ;;  %s1221_s16 = sshll.u32 %s1045_s27, 2 }
  0x31   : > { %372 = vadd.xlane.f32.xlu0 %v371_v1  ;;  %438 = vmatpush.bf16.msra.mxu0 %v711_v14  ;;  %v811_v28 = vld [vmem:[%s1304_s2] ss:$0 sm:$0xff]  ;;  %s479_s22 = scalar_lea.hbm %s1307_s5, %s1221_s16  ;;  %vm446_vm5 = vcmask 257024   ;;  %s351_s23 = scalar_lea.vmem [#allocation8], %s1218_s14 }
  0x32   : > { %v812_v32 = vld [vmem:[%s1306_s4] ss:$0 sm:$0xff]  ;;  %s481_s13 = sshll.u32 %s351_s23, 4  ;;  %s483_s18 = sshll.u32 %s479_s22, 4  ;;  %s482_s13 = int_to_ptr.vmem [resolvable:$true] %s481_s13  ;;  %s484_s18 = int_to_ptr.hbm [resolvable:$true] %s483_s18 }
  0x33   : > { %s1060_s20 = smov 96   ;;  %s458_s27 = scalar_lea.sflag [#allocation4], %s1196_s12 }
  0x34   : > { %s921_s1 = sshra.s32 %s484_s18, 4  ;;  %s927_s17 = scalar_lea.hbm %s1307_s5, 8  ;;  %s922_s1 = int_to_ptr.hbm [resolvable:$true] %s921_s1 }
  0x35   : > { %439 = vmatpush.bf16.msra.mxu0 %v710_v15  ;;  %s923_s3 = scalar_lea.hbm %s922_s1, 4  ;;  %p928_p11 = scmp.lt.s32.totalorder %s922_s1, %s1307_s5 }
  0x36   : > { %v814_v3 = vpop.eup %813  ;;  %p924_p1 = scmp.ne.s32.totalorder %s922_s1, %s923_s3  ;;  %p929_p12 = scmp.lt.s32.totalorder %s927_s17, %s923_s3 }
  0x37   : > { %v375_v4 = vmul.f32 32.0, %v814_v3  ;;  %vm379_vm1 = vweird.f32 %v814_v3 }
  0x38   : > { %p925_p3 = pnand %p924_p1, %p1176_p2  ;;  %p930_p13 = por %p929_p12, %p928_p11 }
  0x39   : > { %v376_v5 = vsub.f32 1.0, %v375_v4 }
  0x3a   : > { %p926_p7 = pneg %p925_p3 }
  0x3b   : > { %v377_v6 = vmul.f32 %v814_v3, %v376_v5 }
  0x3c   : > { %p931_p0 = pnand %p930_p13, %p926_p7 }
  0x3d   : > { %v378_v7 = vadd.f32 %v814_v3, %v377_v6 }
  0x3f   : > { %v380_v8 = vsel %vm379_vm1, %v814_v3, %v378_v7 }
  0xa4   : > { %v373_v9 = vpop.xlane.xlu0 %372 }
  0xa5   : > { %v381_v10 = vmul.f32 %v380_v8, %v373_v9 }
  0xa7   : > { %v382_v11 = vsub.f32 %v367_v0, %v381_v10 }
  0xa9   : > { %v383_v12 = vmul.f32 %v382_v11, %v382_v11 }
  0xab   : > { %v384_v13 = vsel %vm370_vm0, %v383_v12, 0.0 }
  0xac   : > { %385 = vadd.xlane.f32.xlu0 %v384_v13 }
 0x11f   : > { %v386_v16 = vpop.xlane.xlu0 %385 }
 0x120   : > { %v387_v17 = vmul.f32 %v386_v16, %v380_v8 }
 0x122   : > { %v388_v18 = vadd.f32 1e-05, %v387_v17 }
 0x124   : > { %815 = vrsqrt.f32 %v388_v18  ;;  %vm395_vm3 = vweird.f32 %v388_v18 }
 0x12a   : > { %v816_v19 = vpop.eup %815 }
 0x12b   : > { %v390_v20 = vmul.f32 %v816_v19, %v388_v18  ;;  %vm396_vm2 = vweird.f32 %v816_v19 }
 0x12c   : > { %vm397_vm4 = vmor %vm395_vm3, %vm396_vm2 }
 0x12d   : > { %v391_v21 = vmul.f32 %v816_v19, %v390_v20 }
 0x12f   : > { %v392_v22 = vmul.f32 0.5, %v391_v21 }
 0x131   : > { %v393_v23 = vsub.f32 1.5, %v392_v22 }
 0x133   : > { %v394_v24 = vmul.f32 %v816_v19, %v393_v23 }
 0x135   : > { %v398_v26 = vsel %vm397_vm4, %v816_v19, %v394_v24 }
 0x136   : > { %v399_v27 = vmul.f32 %v398_v26, %v382_v11 }
 0x138   : > { %v403_v29 = vmul.f32 %v810_v25, %v399_v27 }
 0x13a   : > { %v407_v30 = vadd.f32 %v811_v28, %v403_v29 }
 0x13c   : > { %v408_v31 = vpack.c.bf16 %v407_v30, %v407_v30 }
 0x13e   : > { %701 = vmatmul.msk.bf16.vlgmr.msra.gmra.mxu0 %vm370_vm0, %v408_v31 }
 0x1bb   : > { %v441_v33 = vpop.f32.mrf.mxu0 }
 0x1bc   : > { %v442_v34 = vadd.f32 %v812_v32, %v441_v33 }
 0x1be   : > { %v445_v35 = vpack.c.bf16 %v442_v34, %v442_v34 }
 0x1c0   : > { %449 = vrot.lane.b32.xlu1 %v445_v35, %s1060_s20  ;;  %447 = vst.msk [vmem:[%s351_s23] sm:$0xf] %vm446_vm5, %v445_v35 }
 0x1c1   : > { %934 = shalt.err (!%p931_p0)
}
 0x1c2   : > { %722 = dma.vmem_to_hbm [thread:$0]  (%p1176_p2), %s482_s13, 64, %s484_s18, %s458_s27  }
 0x1c3   : > { %v443_v36 = vpop.f32.mrf.mxu0  ;;  %s1061_s12 = smov 64   ;;  %s494_s8 = scalar_lea.hbm %s1308_s6, %s1221_s16 }
 0x1c4   : > { %s462_s1 = sand.u32 1, %s1133_s30   ;;  %s358_s3 = scalar_lea.vmem [#allocation9], %s1218_s14 }
 0x1c5   : > { %s496_s9 = sshll.u32 %s358_s3, 4  ;;  %s498_s17 = sshll.u32 %s494_s8, 4  ;;  %s497_s9 = int_to_ptr.vmem [resolvable:$true] %s496_s9  ;;  %s499_s17 = int_to_ptr.hbm [resolvable:$true] %s498_s17 }
 0x1c6   : > { %s509_s13 = scalar_lea.hbm %s1309_s7, %s1221_s16  ;;  %s1251_s18 = scalar_lea.sflag [#allocation10], %s462_s1 }
 0x1c7   : > { %s949_s27 = sshra.s32 %s499_s17, 4  ;;  %s955_s20 = scalar_lea.hbm %s1308_s6, 8  ;;  %s950_s27 = int_to_ptr.hbm [resolvable:$true] %s949_s27 }
 0x1c8   : > { %453 = vrot.lane.b32.xlu1 %v445_v35, %s1061_s12  ;;  %s951_s12 = scalar_lea.hbm %s950_s27, 4  ;;  %p956_p10 = scmp.lt.s32.totalorder %s950_s27, %s1308_s6 }
 0x1c9   : > { %p952_p4 = scmp.ne.s32.totalorder %s950_s27, %s951_s12  ;;  %p957_p1 = scmp.lt.s32.totalorder %s955_s20, %s951_s12 }
 0x1cb   : > { %p953_p6 = pnand %p952_p4, %p1176_p2  ;;  %p958_p3 = por %p957_p1, %p956_p10 }
 0x1cd   : > { %p954_p9 = pneg %p953_p6 }
 0x1cf   : > { %p959_p7 = pnand %p958_p3, %p954_p9 }
 0x232   : > { %v450_v37 = vpop.permute.xlu1 %449 }
 0x233   : > { %452 = vst.msk [vmem:[%s358_s3] sm:$0xf] %vm446_vm5, %v450_v37 }
 0x234   : > { %962 = shalt.err (!%p959_p7)
}
 0x235   : > { %723 = dma.vmem_to_hbm [thread:$0]  (%p1176_p2), %s497_s9, 64, %s499_s17, %s1251_s18  }
 0x236   : > { %s365_s16 = scalar_lea.vmem [#allocation11], %s1218_s14  ;;  %s513_s3 = sshll.u32 %s509_s13, 4  ;;  %s514_s3 = int_to_ptr.hbm [resolvable:$true] %s513_s3 }
 0x237   : > { %s511_s1 = sshll.u32 %s365_s16, 4  ;;  %s977_s0 = sshra.s32 %s514_s3, 4  ;;  %s512_s1 = int_to_ptr.vmem [resolvable:$true] %s511_s1  ;;  %s978_s0 = int_to_ptr.hbm [resolvable:$true] %s977_s0 }
 0x238   : > { %s979_s21 = scalar_lea.hbm %s978_s0, 4  ;;  %s983_s12 = scalar_lea.hbm %s1309_s7, 8 }
 0x239   : > { %p980_p11 = scmp.ne.s32.totalorder %s978_s0, %s979_s21  ;;  %p984_p0 = scmp.lt.s32.totalorder %s978_s0, %s1309_s7 }
 0x23a   : > { %v454_v38 = vpop.permute.xlu1 %453  ;;  %p985_p4 = scmp.lt.s32.totalorder %s983_s12, %s979_s21 }
 0x23b   : > { %456 = vst.msk [vmem:[%s365_s16] sm:$0xf] %vm446_vm5, %v454_v38  ;;  %p981_p12 = pnand %p980_p11, %p1176_p2 }
 0x23c   : > { %p986_p6 = por %p985_p4, %p984_p0 }
 0x23d   : > { %p982_p13 = pneg %p981_p12 }
 0x23f   : > { %p987_p9 = pnand %p986_p6, %p982_p13 }
 0x241   : > { %990 = shalt.err (!%p987_p9)
}
 0x242   : > { %724 = dma.vmem_to_hbm [thread:$0]  (%p1176_p2), %s512_s1, 64, %s514_s3, %s1251_s18  }
 0x243 PF: > { %s525_s17 = sand.u32 1, %s1033_s24   ;;  %p740_p10 = pnand %p683_p8, %p1148_p5 }
 0x244   : > { %s526_s13 = scalar_lea.sflag [#allocation4], %s525_s17 }
 0x245   : > { %p741_p1 = pneg %p740_p10 }
 0x247   : > { %1024 = dma.done.wait (%p741_p1), %s526_s13, 64  }
 0x248   : > { %1026 = vsyncadd (%p741_p1), %s526_s13, 4294967232  ;;  %s1321_s30 = sadd.s32 4294967294, %s1053_s29  }
 0x249   : > { %s535_s23 = sand.u32 1, %s1321_s30  }
 0x24a   : > { %s536_s20 = scalar_lea.sflag [#allocation10], %s535_s23 }
 0x24b   : > { %1028 = dma.done.wait (%p741_p1), %s536_s20, 128  }
 0x24c   : > { %1030 = vsyncadd (%p741_p1), %s536_s20, 4294967168  ;;  %s28_s29 = sadd.s32 1, %s1053_s29   ;;  %s1322_s24 = smov %s1037_s25 }
 0x24d   : > { %p25_p2 = scmp.ge.s32.totalorder %s28_s29, 4   ;;  %s1323_s25 = smov %s1041_s26 }
 0x24e   : > { %s1324_s26 = smov %s1186_s19  ;;  %s1325_s27 = smov %s1049_s28 }
 0x24f   : > { %s1326_s28 = smov %s1328_s11  ;;  %27 = sbr.rel (!%p25_p2) target bundleno = 13 (0xd), region = 125 }
 0x254   :  { %552 = vsyncpa [#allocation3], 1 }
 0x255   :  { %554 = vsyncpa [#allocation3 + $0x1], 1 }
 0x256   :  { %555 = vsyncpa [#allocation6], 1 }
 0x257   :  { %556 = vsyncpa [#allocation4], 1 }
 0x258   :  { %558 = vsyncpa [#allocation4 + $0x1], 1 }
 0x259   :  { %559 = vsyncpa [#allocation10], 1 }
 0x25a   :  { %561 = vsyncpa [#allocation10 + $0x1], 1 }

</bundles_post_ra>
